<compile_context>
chip_gen: v6e
topology: v6e:2x2x1
jax: 0.10.0
libtpu: 0.0.40
codegen_flags: <defaults>
</compile_context>

<pallas_src>
import functools

import jax
import jax.numpy as jnp
from jax.experimental import pallas as pl
from jax.experimental.pallas import tpu as pltpu

LANES = 128
BLOCK_ROWS = 2048        # (2048, 128) f32 block = 1 MiB per input per buffer
_NEG = -1e30             # finite stand-in for -inf (avoids inf-inf NaNs)


def _kd_kernel(p_ref, t_ref, out_ref,
               m_p, s_p, m_t, s_t, cnt, acc, lse_p_v, lse_t_v,
               *, ignore_label, n_valid, block_rows):
    pass_id = pl.program_id(0)
    step = pl.program_id(1)
    last = pl.num_programs(1) - 1

    p = p_ref[...].astype(jnp.float32)
    t = t_ref[...].astype(jnp.float32)

    # Validity of the (possibly partial) tail block: global flat index < n.
    # (int32 flat index: fine for any realistic segmentation-KD size.)
    row = jax.lax.broadcasted_iota(jnp.int32, p.shape, 0)
    lane = jax.lax.broadcasted_iota(jnp.int32, p.shape, 1)
    flat_idx = (step * block_rows + row) * LANES + lane
    mask = (flat_idx < n_valid) & (t >= 0.0) & (t != ignore_label)

    # ---- init (once, at the very first grid step) ---------------------------
    @pl.when(jnp.logical_and(pass_id == 0, step == 0))
    def _():
        m_p[...] = jnp.full_like(m_p, _NEG)
        s_p[...] = jnp.zeros_like(s_p)
        m_t[...] = jnp.full_like(m_t, _NEG)
        s_t[...] = jnp.zeros_like(s_t)
        cnt[...] = jnp.zeros_like(cnt)
        acc[...] = jnp.zeros_like(acc)

    # ---- pass 0: mask count + per-lane streaming logsumexp stats ------------
    @pl.when(pass_id == 0)
    def _():
        cnt[...] += jnp.sum(jnp.where(mask, 1.0, 0.0), axis=0, keepdims=True)

        def update(v, m_ref, s_ref):
            # per-lane block max / sum-exp (1 exp per element), then a tiny
            # (1,128) running-stat rescale instead of a full-tile rescale.
            bm = jnp.max(jnp.where(mask, v, _NEG), axis=0, keepdims=True)
            bs = jnp.sum(jnp.where(mask, jnp.exp(v - bm), 0.0),
                         axis=0, keepdims=True)
            m_old = m_ref[...]
            m_new = jnp.maximum(m_old, bm)
            s_ref[...] = (s_ref[...] * jnp.exp(m_old - m_new)
                          + bs * jnp.exp(bm - m_new))
            m_ref[...] = m_new

        update(p, m_p, s_p)
        update(t, m_t, s_t)

    # ---- pass 1 step 0: hoisted global LSE (computed once, reused) ----------
    @pl.when(jnp.logical_and(pass_id == 1, step == 0))
    def _():
        def lse(m_ref, s_ref):
            gm = jnp.max(m_ref[...])
            return gm + jnp.log(jnp.sum(s_ref[...] * jnp.exp(m_ref[...] - gm)))
        lse_p_v[...] = jnp.full(lse_p_v.shape, lse(m_p, s_p), dtype=jnp.float32)
        lse_t_v[...] = jnp.full(lse_t_v.shape, lse(m_t, s_t), dtype=jnp.float32)

    # ---- pass 1: masked KL accumulation --------------------------------------
    @pl.when(pass_id == 1)
    def _():
        x = p - lse_p_v[...]     # log_softmax(predict[mask]) on the grid
        tt = t - lse_t_v[...]    # log_softmax(target[mask])
        # torch.kl_div (log_target=False): xlogy(tt, tt) - tt * x
        xlogy = jnp.where(tt == 0.0, 0.0, tt * jnp.log(tt))
        term = xlogy - tt * x
        acc[...] += jnp.sum(jnp.where(mask, term, 0.0), axis=0, keepdims=True)

    # ---- finalize -------------------------------------------------------------
    @pl.when(jnp.logical_and(pass_id == 1, step == last))
    def _():
        total = jnp.sum(acc[...])
        count = jnp.sum(cnt[...])
        out_ref[...] = jnp.full(out_ref.shape, total / count,
                                dtype=out_ref.dtype)


def criterion_kd(predict, target, weight=None, ignore_label=255):
    """JAX/Pallas equivalent of CriterionKD.forward (weight unused, as in ref)."""
    assert predict.ndim == 4 and target.ndim == 4
    assert predict.shape == target.shape

    n = int(predict.size)
    # Keep native dtype: cast to f32 inside the kernel (free on the VPU),
    # halving HBM traffic for bf16 inputs.
    p_flat = predict.reshape(-1)
    t_flat = target.reshape(-1)

    # Only a sub-128-element remainder is ever padded (and only when needed);
    # padded target = -1 fails the (target >= 0) test and the iota mask also
    # excludes it.  The previous pad-to-block-multiple full-array copy is gone.
    rem = (-n) % LANES
    if rem:
        p_flat = jnp.pad(p_flat, (0, rem))
        t_flat = jnp.pad(t_flat, (0, rem), constant_values=-1.0)
    rows = (n + rem) // LANES

    p2 = p_flat.reshape(rows, LANES)
    t2 = t_flat.reshape(rows, LANES)

    # Block: whole array if it is small, else (2048, 128) with a partial last
    # block masked in-kernel.  Either way the (8,128)/full-dim rule is met.
    block_rows = rows if rows < BLOCK_ROWS else BLOCK_ROWS
    num_blocks = pl.cdiv(rows, block_rows)

    kernel = functools.partial(_kd_kernel,
                               ignore_label=float(ignore_label),
                               n_valid=n,
                               block_rows=int(block_rows))

    out = pl.pallas_call(
        kernel,
        out_shape=jax.ShapeDtypeStruct((1, LANES), jnp.float32),
        grid_spec=pltpu.PrefetchScalarGridSpec(
            num_scalar_prefetch=0,
            grid=(2, num_blocks),  # (pass, row-block); row-block iterates fastest
            in_specs=[
                pl.BlockSpec((block_rows, LANES), lambda p_, s: (s, 0)),
                pl.BlockSpec((block_rows, LANES), lambda p_, s: (s, 0)),
            ],
            out_specs=pl.BlockSpec((1, LANES), lambda p_, s: (0, 0)),
            scratch_shapes=[pltpu.VMEM((1, LANES), jnp.float32)] * 8,
        ),
        compiler_params=pltpu.CompilerParams(
            dimension_semantics=("arbitrary", "arbitrary")),
    )(p2, t2)
    return out[0, 0]


def _reference(predict, target, ignore_label=255):
    """Pure-JAX reference of the same math (for sanity checking)."""
    p = predict.reshape(-1).astype(jnp.float32)
    t = target.reshape(-1).astype(jnp.float32)
    m = jnp.logical_and(t >= 0.0, t != float(ignore_label))
    lse_p = jax.scipy.special.logsumexp(jnp.where(m, p, -jnp.inf))
    lse_t = jax.scipy.special.logsumexp(jnp.where(m, t, -jnp.inf))
    x = p - lse_p
    tt = t - lse_t
    xlogy = jnp.where(tt == 0.0, 0.0, tt * jnp.log(tt))
    term = xlogy - tt * x
    return jnp.sum(jnp.where(m, term, 0.0)) / jnp.sum(m)


if __name__ == "__main__":
    key = jax.random.PRNGKey(0)
    k1, k2 = jax.random.split(key)
    predict = jax.random.normal(k1, (2, 4, 16, 16), dtype=jnp.float32)
    # target values in [-1, 3): some elements are masked out (< 0), most kept
    target = jax.random.uniform(k2, (2, 4, 16, 16), dtype=jnp.float32,
                                minval=-1.0, maxval=3.0)

    loss = criterion_kd(predict, target)
    jax.block_until_ready(loss)
    ref = _reference(predict, target)
    # Faithful to PyTorch's KLDivLoss misuse: result is NaN (log of log-probs).
    assert bool(jnp.allclose(loss, ref, atol=1e-5, equal_nan=True)), (loss, ref)

    # Non-NaN sanity check: exactly one element passes the mask -> loss == 0.
    # This exercises masking, count and the global logsumexp with a real value.
    t_single = jnp.full((2, 4, 16, 16), -1.0, dtype=jnp.float32)
    t_single = t_single.at[0, 0, 0, 0].set(1.5)
    loss1 = criterion_kd(predict, t_single)
    jax.block_until_ready(loss1)
    ref1 = _reference(predict, t_single)
    assert bool(jnp.allclose(loss1, ref1, atol=1e-6)), (loss1, ref1)
    assert bool(jnp.allclose(loss1, 0.0, atol=1e-6)), loss1

    # Ragged size (n % 128 != 0) exercises the remainder / tail-mask path.
    k3, k4 = jax.random.split(k1)
    p3 = jax.random.normal(k3, (1, 3, 7, 9), dtype=jnp.float32)
    t3 = jax.random.uniform(k4, (1, 3, 7, 9), dtype=jnp.float32,
                            minval=-1.0, maxval=3.0)
    loss3 = criterion_kd(p3, t3)
    jax.block_until_ready(loss3)
    ref3 = _reference(p3, t3)
    assert bool(jnp.allclose(loss3, ref3, atol=1e-5, equal_nan=True)), (loss3, ref3)

    print("KERNEL_OK")
</pallas_src>

<mosaic_0001>
module attributes {stable_mosaic.version = 11 : i64} {
  func.func @_kd_kernel(%arg0: i32, %arg1: i32, %arg2: memref<16x128xf32, #tpu.memory_space<vmem>>, %arg3: memref<16x128xf32, #tpu.memory_space<vmem>>, %arg4: memref<1x128xf32, #tpu.memory_space<vmem>>, %arg5: memref<1x128xf32, #tpu.memory_space<vmem>>, %arg6: memref<1x128xf32, #tpu.memory_space<vmem>>, %arg7: memref<1x128xf32, #tpu.memory_space<vmem>>, %arg8: memref<1x128xf32, #tpu.memory_space<vmem>>, %arg9: memref<1x128xf32, #tpu.memory_space<vmem>>, %arg10: memref<1x128xf32, #tpu.memory_space<vmem>>, %arg11: memref<1x128xf32, #tpu.memory_space<vmem>>, %arg12: memref<1x128xf32, #tpu.memory_space<vmem>>) attributes {dimension_semantics = [#tpu.dimension_semantics<arbitrary>, #tpu.dimension_semantics<arbitrary>], iteration_bounds = array<i64: 2, 1>, scalar_prefetch = 0 : i64, scratch_operands = 8 : i64, tpu.core_type = #tpu.core_type<tc>, window_params = [{transform_indices = @transform_0, window_bounds = array<i64: 16, 128>}, {transform_indices = @transform_1, window_bounds = array<i64: 16, 128>}, {pipeline_mode = #tpu.pipeline_mode<synchronous>, transform_indices = @transform_2, window_bounds = array<i64: 1, 128>}]} {
    %c0 = arith.constant 0 : index
    %c0_0 = arith.constant 0 : index
    %0 = vector.load %arg2[%c0, %c0_0] : memref<16x128xf32, #tpu.memory_space<vmem>>, vector<16x128xf32>
    %c0_1 = arith.constant 0 : index
    %c0_2 = arith.constant 0 : index
    %1 = vector.load %arg3[%c0_1, %c0_2] : memref<16x128xf32, #tpu.memory_space<vmem>>, vector<16x128xf32>
    %2 = tpu.iota {dimensions = array<i32: 0>} : vector<16x128xi32>
    %3 = tpu.iota {dimensions = array<i32: 1>} : vector<16x128xi32>
    %c16_i32 = arith.constant 16 : i32
    %4 = arith.muli %arg1, %c16_i32 : i32
    %5 = vector.broadcast %4 : i32 to vector<16x128xi32>
    %6 = arith.addi %5, %2 : vector<16x128xi32>
    %c128_i32 = arith.constant 128 : i32
    %7 = vector.broadcast %c128_i32 : i32 to vector<16x128xi32>
    %8 = arith.muli %6, %7 : vector<16x128xi32>
    %9 = arith.addi %8, %3 : vector<16x128xi32>
    %c2048_i32 = arith.constant 2048 : i32
    %10 = vector.broadcast %c2048_i32 : i32 to vector<16x128xi32>
    %11 = arith.cmpi slt, %9, %10 : vector<16x128xi32>
    %cst = arith.constant 0.000000e+00 : f32
    %12 = vector.broadcast %cst : f32 to vector<16x128xf32>
    %13 = arith.cmpf oge, %1, %12 : vector<16x128xf32>
    %14 = arith.andi %11, %13 : vector<16x128xi1>
    %cst_3 = arith.constant 2.550000e+02 : f32
    %15 = vector.broadcast %cst_3 : f32 to vector<16x128xf32>
    %16 = arith.cmpf one, %1, %15 : vector<16x128xf32>
    %17 = arith.andi %14, %16 : vector<16x128xi1>
    %c0_i32 = arith.constant 0 : i32
    %18 = arith.cmpi eq, %arg0, %c0_i32 : i32
    %c0_i32_4 = arith.constant 0 : i32
    %19 = arith.cmpi eq, %arg1, %c0_i32_4 : i32
    %20 = arith.andi %18, %19 : i1
    %21 = arith.extui %20 : i1 to i32
    %c0_i32_5 = arith.constant 0 : i32
    %22 = arith.cmpi ne, %21, %c0_i32_5 : i32
    scf.if %22 {
      %cst_15 = arith.constant -1.000000e+30 : f32
      %39 = vector.broadcast %cst_15 : f32 to vector<1x128xf32>
      %c0_16 = arith.constant 0 : index
      %c0_17 = arith.constant 0 : index
      %40 = vector.load %arg5[%c0_16, %c0_17] : memref<1x128xf32, #tpu.memory_space<vmem>>, vector<1x128xf32>
      tpu.vector_store %arg5[%c0_16, %c0_17], %39 {strides = array<i32>} : memref<1x128xf32, #tpu.memory_space<vmem>>, vector<1x128xf32>,
      %cst_18 = arith.constant 0.000000e+00 : f32
      %41 = vector.broadcast %cst_18 : f32 to vector<1x128xf32>
      %c0_19 = arith.constant 0 : index
      %c0_20 = arith.constant 0 : index
      %42 = vector.load %arg6[%c0_19, %c0_20] : memref<1x128xf32, #tpu.memory_space<vmem>>, vector<1x128xf32>
      tpu.vector_store %arg6[%c0_19, %c0_20], %41 {strides = array<i32>} : memref<1x128xf32, #tpu.memory_space<vmem>>, vector<1x128xf32>,
      %cst_21 = arith.constant -1.000000e+30 : f32
      %43 = vector.broadcast %cst_21 : f32 to vector<1x128xf32>
      %c0_22 = arith.constant 0 : index
      %c0_23 = arith.constant 0 : index
      %44 = vector.load %arg7[%c0_22, %c0_23] : memref<1x128xf32, #tpu.memory_space<vmem>>, vector<1x128xf32>
      tpu.vector_store %arg7[%c0_22, %c0_23], %43 {strides = array<i32>} : memref<1x128xf32, #tpu.memory_space<vmem>>, vector<1x128xf32>,
      %cst_24 = arith.constant 0.000000e+00 : f32
      %45 = vector.broadcast %cst_24 : f32 to vector<1x128xf32>
      %c0_25 = arith.constant 0 : index
      %c0_26 = arith.constant 0 : index
      %46 = vector.load %arg8[%c0_25, %c0_26] : memref<1x128xf32, #tpu.memory_space<vmem>>, vector<1x128xf32>
      tpu.vector_store %arg8[%c0_25, %c0_26], %45 {strides = array<i32>} : memref<1x128xf32, #tpu.memory_space<vmem>>, vector<1x128xf32>,
      %cst_27 = arith.constant 0.000000e+00 : f32
      %47 = vector.broadcast %cst_27 : f32 to vector<1x128xf32>
      %c0_28 = arith.constant 0 : index
      %c0_29 = arith.constant 0 : index
      %48 = vector.load %arg9[%c0_28, %c0_29] : memref<1x128xf32, #tpu.memory_space<vmem>>, vector<1x128xf32>
      tpu.vector_store %arg9[%c0_28, %c0_29], %47 {strides = array<i32>} : memref<1x128xf32, #tpu.memory_space<vmem>>, vector<1x128xf32>,
      %cst_30 = arith.constant 0.000000e+00 : f32
      %49 = vector.broadcast %cst_30 : f32 to vector<1x128xf32>
      %c0_31 = arith.constant 0 : index
      %c0_32 = arith.constant 0 : index
      %50 = vector.load %arg10[%c0_31, %c0_32] : memref<1x128xf32, #tpu.memory_space<vmem>>, vector<1x128xf32>
      tpu.vector_store %arg10[%c0_31, %c0_32], %49 {strides = array<i32>} : memref<1x128xf32, #tpu.memory_space<vmem>>, vector<1x128xf32>,
    } else {
    }
    %c0_i32_6 = arith.constant 0 : i32
    %23 = arith.cmpi eq, %arg0, %c0_i32_6 : i32
    %24 = arith.extui %23 : i1 to i32
    %c0_i32_7 = arith.constant 0 : i32
    %25 = arith.cmpi ne, %24, %c0_i32_7 : i32
    scf.if %25 {
      %c0_15 = arith.constant 0 : index
      %c0_16 = arith.constant 0 : index
      %39 = vector.load %arg9[%c0_15, %c0_16] : memref<1x128xf32, #tpu.memory_space<vmem>>, vector<1x128xf32>
      %cst_17 = arith.constant 1.000000e+00 : f32
      %cst_18 = arith.constant 0.000000e+00 : f32
      %40 = vector.broadcast %cst_17 : f32 to vector<16x128xf32>
      %41 = vector.broadcast %cst_18 : f32 to vector<16x128xf32>
      %42 = arith.select %17, %40, %41 : vector<16x128xi1>, vector<16x128xf32>
      %cst_19 = arith.constant dense<0.000000e+00> : vector<128xf32>
      %43 = vector.multi_reduction <add>, %42, %cst_19 [0] : vector<16x128xf32> to vector<128xf32>
      %44 = vector.shape_cast %43 : vector<128xf32> to vector<1x128xf32>
      %45 = arith.addf %39, %44 : vector<1x128xf32>
      %c0_20 = arith.constant 0 : index
      %c0_21 = arith.constant 0 : index
      %46 = vector.load %arg9[%c0_20, %c0_21] : memref<1x128xf32, #tpu.memory_space<vmem>>, vector<1x128xf32>
      tpu.vector_store %arg9[%c0_20, %c0_21], %45 {strides = array<i32>} : memref<1x128xf32, #tpu.memory_space<vmem>>, vector<1x128xf32>,
      %cst_22 = arith.constant -1.000000e+30 : f32
      %47 = vector.broadcast %cst_22 : f32 to vector<16x128xf32>
      %48 = arith.select %17, %0, %47 : vector<16x128xi1>, vector<16x128xf32>
      %cst_23 = arith.constant dense<0xFF800000> : vector<128xf32>
      %49 = vector.multi_reduction <maximumf>, %48, %cst_23 [0] : vector<16x128xf32> to vector<128xf32>
      %50 = vector.shape_cast %49 : vector<128xf32> to vector<1x128xf32>
      %51 = vector.broadcast %50 : vector<1x128xf32> to vector<16x128xf32>
      %52 = arith.subf %0, %51 : vector<16x128xf32>
      %53 = math.exp %52 : vector<16x128xf32>
      %cst_24 = arith.constant 0.000000e+00 : f32
      %54 = vector.broadcast %cst_24 : f32 to vector<16x128xf32>
      %55 = arith.select %17, %53, %54 : vector<16x128xi1>, vector<16x128xf32>
      %cst_25 = arith.constant dense<0.000000e+00> : vector<128xf32>
      %56 = vector.multi_reduction <add>, %55, %cst_25 [0] : vector<16x128xf32> to vector<128xf32>
      %57 = vector.shape_cast %56 : vector<128xf32> to vector<1x128xf32>
      %c0_26 = arith.constant 0 : index
      %c0_27 = arith.constant 0 : index
      %58 = vector.load %arg5[%c0_26, %c0_27] : memref<1x128xf32, #tpu.memory_space<vmem>>, vector<1x128xf32>
      %59 = arith.maximumf %58, %50 : vector<1x128xf32>
      %c0_28 = arith.constant 0 : index
      %c0_29 = arith.constant 0 : index
      %60 = vector.load %arg6[%c0_28, %c0_29] : memref<1x128xf32, #tpu.memory_space<vmem>>, vector<1x128xf32>
      %61 = arith.subf %58, %59 : vector<1x128xf32>
      %62 = math.exp %61 : vector<1x128xf32>
      %63 = arith.mulf %60, %62 : vector<1x128xf32>
      %64 = arith.subf %50, %59 : vector<1x128xf32>
      %65 = math.exp %64 : vector<1x128xf32>
      %66 = arith.mulf %57, %65 : vector<1x128xf32>
      %67 = arith.addf %63, %66 : vector<1x128xf32>
      %c0_30 = arith.constant 0 : index
      %c0_31 = arith.constant 0 : index
      %68 = vector.load %arg6[%c0_30, %c0_31] : memref<1x128xf32, #tpu.memory_space<vmem>>, vector<1x128xf32>
      tpu.vector_store %arg6[%c0_30, %c0_31], %67 {strides = array<i32>} : memref<1x128xf32, #tpu.memory_space<vmem>>, vector<1x128xf32>,
      %c0_32 = arith.constant 0 : index
      %c0_33 = arith.constant 0 : index
      %69 = vector.load %arg5[%c0_32, %c0_33] : memref<1x128xf32, #tpu.memory_space<vmem>>, vector<1x128xf32>
      tpu.vector_store %arg5[%c0_32, %c0_33], %59 {strides = array<i32>} : memref<1x128xf32, #tpu.memory_space<vmem>>, vector<1x128xf32>,
      %cst_34 = arith.constant -1.000000e+30 : f32
      %70 = vector.broadcast %cst_34 : f32 to vector<16x128xf32>
      %71 = arith.select %17, %1, %70 : vector<16x128xi1>, vector<16x128xf32>
      %cst_35 = arith.constant dense<0xFF800000> : vector<128xf32>
      %72 = vector.multi_reduction <maximumf>, %71, %cst_35 [0] : vector<16x128xf32> to vector<128xf32>
      %73 = vector.shape_cast %72 : vector<128xf32> to vector<1x128xf32>
      %74 = vector.broadcast %73 : vector<1x128xf32> to vector<16x128xf32>
      %75 = arith.subf %1, %74 : vector<16x128xf32>
      %76 = math.exp %75 : vector<16x128xf32>
      %cst_36 = arith.constant 0.000000e+00 : f32
      %77 = vector.broadcast %cst_36 : f32 to vector<16x128xf32>
      %78 = arith.select %17, %76, %77 : vector<16x128xi1>, vector<16x128xf32>
      %cst_37 = arith.constant dense<0.000000e+00> : vector<128xf32>
      %79 = vector.multi_reduction <add>, %78, %cst_37 [0] : vector<16x128xf32> to vector<128xf32>
      %80 = vector.shape_cast %79 : vector<128xf32> to vector<1x128xf32>
      %c0_38 = arith.constant 0 : index
      %c0_39 = arith.constant 0 : index
      %81 = vector.load %arg7[%c0_38, %c0_39] : memref<1x128xf32, #tpu.memory_space<vmem>>, vector<1x128xf32>
      %82 = arith.maximumf %81, %73 : vector<1x128xf32>
      %c0_40 = arith.constant 0 : index
      %c0_41 = arith.constant 0 : index
      %83 = vector.load %arg8[%c0_40, %c0_41] : memref<1x128xf32, #tpu.memory_space<vmem>>, vector<1x128xf32>
      %84 = arith.subf %81, %82 : vector<1x128xf32>
      %85 = math.exp %84 : vector<1x128xf32>
      %86 = arith.mulf %83, %85 : vector<1x128xf32>
      %87 = arith.subf %73, %82 : vector<1x128xf32>
      %88 = math.exp %87 : vector<1x128xf32>
      %89 = arith.mulf %80, %88 : vector<1x128xf32>
      %90 = arith.addf %86, %89 : vector<1x128xf32>
      %c0_42 = arith.constant 0 : index
      %c0_43 = arith.constant 0 : index
      %91 = vector.load %arg8[%c0_42, %c0_43] : memref<1x128xf32, #tpu.memory_space<vmem>>, vector<1x128xf32>
      tpu.vector_store %arg8[%c0_42, %c0_43], %90 {strides = array<i32>} : memref<1x128xf32, #tpu.memory_space<vmem>>, vector<1x128xf32>,
      %c0_44 = arith.constant 0 : index
      %c0_45 = arith.constant 0 : index
      %92 = vector.load %arg7[%c0_44, %c0_45] : memref<1x128xf32, #tpu.memory_space<vmem>>, vector<1x128xf32>
      tpu.vector_store %arg7[%c0_44, %c0_45], %82 {strides = array<i32>} : memref<1x128xf32, #tpu.memory_space<vmem>>, vector<1x128xf32>,
    } else {
    }
    %c1_i32 = arith.constant 1 : i32
    %26 = arith.cmpi eq, %arg0, %c1_i32 : i32
    %c0_i32_8 = arith.constant 0 : i32
    %27 = arith.cmpi eq, %arg1, %c0_i32_8 : i32
    %28 = arith.andi %26, %27 : i1
    %29 = arith.extui %28 : i1 to i32
    %c0_i32_9 = arith.constant 0 : i32
    %30 = arith.cmpi ne, %29, %c0_i32_9 : i32
    scf.if %30 {
      %c0_15 = arith.constant 0 : index
      %c0_16 = arith.constant 0 : index
      %39 = vector.load %arg5[%c0_15, %c0_16] : memref<1x128xf32, #tpu.memory_space<vmem>>, vector<1x128xf32>
      %40 = vector.shape_cast %39 : vector<1x128xf32> to vector<1x1x128xf32>
      %cst_17 = arith.constant dense<0xFF800000> : vector<1xf32>
      %41 = vector.multi_reduction <maximumf>, %40, %cst_17 [1, 2] : vector<1x1x128xf32> to vector<1xf32>
      %42 = vector.shape_cast %41 : vector<1xf32> to vector<1x1x1xf32>
      %43 = vector.extract %42[0, 0, 0] : f32 from vector<1x1x1xf32>
      %c0_18 = arith.constant 0 : index
      %c0_19 = arith.constant 0 : index
      %44 = vector.load %arg6[%c0_18, %c0_19] : memref<1x128xf32, #tpu.memory_space<vmem>>, vector<1x128xf32>
      %c0_20 = arith.constant 0 : index
      %c0_21 = arith.constant 0 : index
      %45 = vector.load %arg5[%c0_20, %c0_21] : memref<1x128xf32, #tpu.memory_space<vmem>>, vector<1x128xf32>
      %46 = vector.broadcast %43 : f32 to vector<1x128xf32>
      %47 = arith.subf %45, %46 : vector<1x128xf32>
      %48 = math.exp %47 : vector<1x128xf32>
      %49 = arith.mulf %44, %48 : vector<1x128xf32>
      %50 = vector.shape_cast %49 : vector<1x128xf32> to vector<1x1x128xf32>
      %cst_22 = arith.constant dense<0.000000e+00> : vector<1xf32>
      %51 = vector.multi_reduction <add>, %50, %cst_22 [1, 2] : vector<1x1x128xf32> to vector<1xf32>
      %52 = vector.shape_cast %51 : vector<1xf32> to vector<1x1x1xf32>
      %53 = vector.extract %52[0, 0, 0] : f32 from vector<1x1x1xf32>
      %54 = math.log %53 : f32
      %55 = arith.addf %43, %54 : f32
      %56 = vector.broadcast %55 : f32 to vector<1x128xf32>
      %c0_23 = arith.constant 0 : index
      %c0_24 = arith.constant 0 : index
      %57 = vector.load %arg11[%c0_23, %c0_24] : memref<1x128xf32, #tpu.memory_space<vmem>>, vector<1x128xf32>
      tpu.vector_store %arg11[%c0_23, %c0_24], %56 {strides = array<i32>} : memref<1x128xf32, #tpu.memory_space<vmem>>, vector<1x128xf32>,
      %c0_25 = arith.constant 0 : index
      %c0_26 = arith.constant 0 : index
      %58 = vector.load %arg7[%c0_25, %c0_26] : memref<1x128xf32, #tpu.memory_space<vmem>>, vector<1x128xf32>
      %59 = vector.shape_cast %58 : vector<1x128xf32> to vector<1x1x128xf32>
      %cst_27 = arith.constant dense<0xFF800000> : vector<1xf32>
      %60 = vector.multi_reduction <maximumf>, %59, %cst_27 [1, 2] : vector<1x1x128xf32> to vector<1xf32>
      %61 = vector.shape_cast %60 : vector<1xf32> to vector<1x1x1xf32>
      %62 = vector.extract %61[0, 0, 0] : f32 from vector<1x1x1xf32>
      %c0_28 = arith.constant 0 : index
      %c0_29 = arith.constant 0 : index
      %63 = vector.load %arg8[%c0_28, %c0_29] : memref<1x128xf32, #tpu.memory_space<vmem>>, vector<1x128xf32>
      %c0_30 = arith.constant 0 : index
      %c0_31 = arith.constant 0 : index
      %64 = vector.load %arg7[%c0_30, %c0_31] : memref<1x128xf32, #tpu.memory_space<vmem>>, vector<1x128xf32>
      %65 = vector.broadcast %62 : f32 to vector<1x128xf32>
      %66 = arith.subf %64, %65 : vector<1x128xf32>
      %67 = math.exp %66 : vector<1x128xf32>
      %68 = arith.mulf %63, %67 : vector<1x128xf32>
      %69 = vector.shape_cast %68 : vector<1x128xf32> to vector<1x1x128xf32>
      %cst_32 = arith.constant dense<0.000000e+00> : vector<1xf32>
      %70 = vector.multi_reduction <add>, %69, %cst_32 [1, 2] : vector<1x1x128xf32> to vector<1xf32>
      %71 = vector.shape_cast %70 : vector<1xf32> to vector<1x1x1xf32>
      %72 = vector.extract %71[0, 0, 0] : f32 from vector<1x1x1xf32>
      %73 = math.log %72 : f32
      %74 = arith.addf %62, %73 : f32
      %75 = vector.broadcast %74 : f32 to vector<1x128xf32>
      %c0_33 = arith.constant 0 : index
      %c0_34 = arith.constant 0 : index
      %76 = vector.load %arg12[%c0_33, %c0_34] : memref<1x128xf32, #tpu.memory_space<vmem>>, vector<1x128xf32>
      tpu.vector_store %arg12[%c0_33, %c0_34], %75 {strides = array<i32>} : memref<1x128xf32, #tpu.memory_space<vmem>>, vector<1x128xf32>,
    } else {
    }
    %c1_i32_10 = arith.constant 1 : i32
    %31 = arith.cmpi eq, %arg0, %c1_i32_10 : i32
    %32 = arith.extui %31 : i1 to i32
    %c0_i32_11 = arith.constant 0 : i32
    %33 = arith.cmpi ne, %32, %c0_i32_11 : i32
    scf.if %33 {
      %c0_15 = arith.constant 0 : index
      %c0_16 = arith.constant 0 : index
      %39 = vector.load %arg11[%c0_15, %c0_16] : memref<1x128xf32, #tpu.memory_space<vmem>>, vector<1x128xf32>
      %40 = vector.broadcast %39 : vector<1x128xf32> to vector<16x128xf32>
      %41 = arith.subf %0, %40 : vector<16x128xf32>
      %c0_17 = arith.constant 0 : index
      %c0_18 = arith.constant 0 : index
      %42 = vector.load %arg12[%c0_17, %c0_18] : memref<1x128xf32, #tpu.memory_space<vmem>>, vector<1x128xf32>
      %43 = vector.broadcast %42 : vector<1x128xf32> to vector<16x128xf32>
      %44 = arith.subf %1, %43 : vector<16x128xf32>
      %cst_19 = arith.constant 0.000000e+00 : f32
      %45 = vector.broadcast %cst_19 : f32 to vector<16x128xf32>
      %46 = arith.cmpf oeq, %44, %45 : vector<16x128xf32>
      %47 = math.log %44 : vector<16x128xf32>
      %48 = arith.mulf %44, %47 : vector<16x128xf32>
      %cst_20 = arith.constant 0.000000e+00 : f32
      %49 = vector.broadcast %cst_20 : f32 to vector<16x128xf32>
      %50 = arith.select %46, %49, %48 : vector<16x128xi1>, vector<16x128xf32>
      %51 = arith.mulf %44, %41 : vector<16x128xf32>
      %52 = arith.subf %50, %51 : vector<16x128xf32>
      %c0_21 = arith.constant 0 : index
      %c0_22 = arith.constant 0 : index
      %53 = vector.load %arg10[%c0_21, %c0_22] : memref<1x128xf32, #tpu.memory_space<vmem>>, vector<1x128xf32>
      %cst_23 = arith.constant 0.000000e+00 : f32
      %54 = vector.broadcast %cst_23 : f32 to vector<16x128xf32>
      %55 = arith.select %17, %52, %54 : vector<16x128xi1>, vector<16x128xf32>
      %cst_24 = arith.constant dense<0.000000e+00> : vector<128xf32>
      %56 = vector.multi_reduction <add>, %55, %cst_24 [0] : vector<16x128xf32> to vector<128xf32>
      %57 = vector.shape_cast %56 : vector<128xf32> to vector<1x128xf32>
      %58 = arith.addf %53, %57 : vector<1x128xf32>
      %c0_25 = arith.constant 0 : index
      %c0_26 = arith.constant 0 : index
      %59 = vector.load %arg10[%c0_25, %c0_26] : memref<1x128xf32, #tpu.memory_space<vmem>>, vector<1x128xf32>
      tpu.vector_store %arg10[%c0_25, %c0_26], %58 {strides = array<i32>} : memref<1x128xf32, #tpu.memory_space<vmem>>, vector<1x128xf32>,
    } else {
    }
    %c1_i32_12 = arith.constant 1 : i32
    %34 = arith.cmpi eq, %arg0, %c1_i32_12 : i32
    %c0_i32_13 = arith.constant 0 : i32
    %35 = arith.cmpi eq, %arg1, %c0_i32_13 : i32
    %36 = arith.andi %34, %35 : i1
    %37 = arith.extui %36 : i1 to i32
    %c0_i32_14 = arith.constant 0 : i32
    %38 = arith.cmpi ne, %37, %c0_i32_14 : i32
    scf.if %38 {
      %c0_15 = arith.constant 0 : index
      %c0_16 = arith.constant 0 : index
      %39 = vector.load %arg10[%c0_15, %c0_16] : memref<1x128xf32, #tpu.memory_space<vmem>>, vector<1x128xf32>
      %40 = vector.shape_cast %39 : vector<1x128xf32> to vector<1x1x128xf32>
      %cst_17 = arith.constant dense<0.000000e+00> : vector<1xf32>
      %41 = vector.multi_reduction <add>, %40, %cst_17 [1, 2] : vector<1x1x128xf32> to vector<1xf32>
      %42 = vector.shape_cast %41 : vector<1xf32> to vector<1x1x1xf32>
      %43 = vector.extract %42[0, 0, 0] : f32 from vector<1x1x1xf32>
      %c0_18 = arith.constant 0 : index
      %c0_19 = arith.constant 0 : index
      %44 = vector.load %arg9[%c0_18, %c0_19] : memref<1x128xf32, #tpu.memory_space<vmem>>, vector<1x128xf32>
      %45 = vector.shape_cast %44 : vector<1x128xf32> to vector<1x1x128xf32>
      %cst_20 = arith.constant dense<0.000000e+00> : vector<1xf32>
      %46 = vector.multi_reduction <add>, %45, %cst_20 [1, 2] : vector<1x1x128xf32> to vector<1xf32>
      %47 = vector.shape_cast %46 : vector<1xf32> to vector<1x1x1xf32>
      %48 = vector.extract %47[0, 0, 0] : f32 from vector<1x1x1xf32>
      %49 = arith.divf %43, %48 : f32
      %50 = vector.broadcast %49 : f32 to vector<1x128xf32>
      %c0_21 = arith.constant 0 : index
      %c0_22 = arith.constant 0 : index
      %51 = vector.load %arg4[%c0_21, %c0_22] : memref<1x128xf32, #tpu.memory_space<vmem>>, vector<1x128xf32>
      tpu.vector_store %arg4[%c0_21, %c0_22], %50 {strides = array<i32>} : memref<1x128xf32, #tpu.memory_space<vmem>>, vector<1x128xf32>,
    } else {
    }
    return
  }
  func.func @transform_0(%arg0: i32, %arg1: i32) -> (i32, i32) {
    %c0_i32 = arith.constant 0 : i32
    %c0_i32_0 = arith.constant 0 : i32
    return %arg1, %c0_i32 : i32, i32
  }
  func.func @transform_1(%arg0: i32, %arg1: i32) -> (i32, i32) {
    %c0_i32 = arith.constant 0 : i32
    %c0_i32_0 = arith.constant 0 : i32
    return %arg1, %c0_i32 : i32, i32
  }
  func.func @transform_2(%arg0: i32, %arg1: i32) -> (i32, i32) {
    %c0_i32 = arith.constant 0 : i32
    %c0_i32_0 = arith.constant 0 : i32
    %c0_i32_1 = arith.constant 0 : i32
    return %c0_i32, %c0_i32_0 : i32, i32
  }
}

</mosaic_0001>

<bundles_post_ra>
// kernel: tpu_custom_call.1
= control target key start
LH: loop header
LB: loop body
LE: loop exit
PB: predicated region body
PF: predicated region fallthrough
CT: control target
= control target key end

     0   :  { %7 = vsyncpa [#allocation11], 0  ;;  %s947_s0 = inlined_call_operand.hbm [shape: f32[16,128], index: 0, kind: input, shape index: {}]   ;;  %s948_s1 = inlined_call_operand.hbm [shape: f32[16,128], index: 1, kind: input, shape index: {}]   ;;  %s949_s2 = inlined_call_operand.hbm [shape: f32[1,128], index: 2, kind: output, shape index: {}]  }
   0x1   :  { %8 = vsyncpa [#allocation14], 0 }
   0x2   :  { %9 = vsyncpa [#allocation12], 0  ;;  %s780_s9 = smov 0   ;;  %s782_s10 = smov 0  }
   0x3   :  { %s784_s11 = smov 0  }
   0x4 LB: > { %s521_s12 = sadd.s32 4294967295, %s755_s11   ;;  %s27_s13 = sadd.s32 1, %s751_s10  ;;  %s755_s11 = sphi %s784_s11, %s15_s11   ;;  %s751_s10 = sphi %s782_s10, %s959_s10   ;;  %s747_s9 = sphi %s780_s9, %s958_s9  }
   0x5   : > { %p29_p0 = scmp.ge.s32.totalorder %s27_s13, 2  ;;  %p522_p1 = scmp.ge.s32.totalorder %s755_s11, 1 }
   0x6   : > { %p105_p2 = scmp.lt.s32.totalorder %s755_s11, 3  ;;  %p807_p4 = scmp.eq.s32.totalorder %s521_s12, 0 }
   0x7   : > { %s961_s13 = smov (%p29_p0, %s27_s13), 0  ;;  %s757_s16 = smov [#allocation10]  }
   0x8   : > { %p801_p3 = pnand %p522_p1, %p105_p2  ;;  %s120_s17 = sshll.u32 %s757_s16, 4  ;;  %s121_s17 = int_to_ptr.vmem [resolvable:$true] %s120_s17 }
   0x9   : > { %s758_s19 = smov [#allocation13]   ;;  %s656_s21 = scalar_lea.vmem %s121_s17, 256 }
   0xa   : > { %p570_p5 = pneg %p801_p3  ;;  %s136_s20 = sshll.u32 %s758_s19, 4  ;;  %s137_s20 = int_to_ptr.vmem [resolvable:$true] %s136_s20 }
   0xb   : > { %p657_p8 = scmp.ne.s32.totalorder %s121_s17, %s656_s21  ;;  %p664_p11 = scmp.lt.s32.totalorder %s121_s17, %s121_s17 }
   0xc   : > { %p815_p6 = pnand %p807_p4, %p570_p5  ;;  %p665_p12 = scmp.lt.s32.totalorder %s656_s21, %s656_s21 }
   0xe   : > { %p647_p7 = pneg %p815_p6  ;;  %p666_p13 = por %p665_p12, %p664_p11 }
  0x10   : > { %p659_p9 = pnand %p657_p8, %p647_p7 }
  0x12   : > { %p660_p10 = pneg %p659_p9 }
  0x14   : > { %p667_p0 = pnand %p666_p13, %p660_p10 }
  0x16   : > { %670 = shalt.err (!%p667_p0)
}
  0x17   : > { %s759_s22 = smov 128   ;;  %s760_s23 = smov 8  }
  0x18   : > { %573 = dma.hbm_to_vmem [thread:$0]  (!%p815_p6), %s947_s0, 256, %s121_s17, [#allocation11], %s759_s22, %s759_s22, %s760_s23  }
  0x19   : > { %s682_s26 = scalar_lea.vmem %s137_s20, 256  ;;  %p690_p8 = scmp.lt.s32.totalorder %s137_s20, %s137_s20 }
  0x1a   : > { %p683_p1 = scmp.ne.s32.totalorder %s137_s20, %s682_s26  ;;  %p691_p9 = scmp.lt.s32.totalorder %s682_s26, %s682_s26 }
  0x1c   : > { %p685_p2 = pnand %p683_p1, %p647_p7  ;;  %p692_p11 = por %p691_p9, %p690_p8 }
  0x1e   : > { %p686_p5 = pneg %p685_p2 }
  0x20   : > { %p693_p10 = pnand %p692_p11, %p686_p5 }
  0x22   : > { %696 = shalt.err (!%p693_p10)
}
  0x23   : > { %576 = dma.hbm_to_vmem [thread:$0]  (!%p815_p6), %s948_s1, 256, %s137_s20, [#allocation14], %s759_s22, %s759_s22, %s760_s23  }
  0x24   : > { %152 = sbr.rel (%p801_p3) target bundleno = 1252 (0x4e4), region = 28 }
  0x29   : > { %734 = dma.done.wait (%p807_p4), [#allocation11], 256  }
  0x2a   : > { %736 = vsyncadd (%p807_p4), [#allocation11], 4294967040 }
  0x2b   : > { %738 = dma.done.wait (%p807_p4), [#allocation14], 256  }
  0x2c   : > { %740 = vsyncadd (%p807_p4), [#allocation14], 4294967040  ;;  %v174_v0 = vlaneseq  ;;  %p197_p7 = scmp.eq.s32.totalorder %s747_s9, 0  ;;  %v848_v7 = vld [vmem:[#allocation10] sm:$0xff]  ;;  %v850_v8 = vld [vmem:[#allocation10 + $0x8] sm:$0xff] }
  0x2d   : > { %v852_v9 = vld [vmem:[#allocation13] sm:$0xff]  ;;  %v854_v10 = vld [vmem:[#allocation13 + $0x8] sm:$0xff]  ;;  %v761_v14 = vmov (%p197_p7), -1e+30   ;;  %v762_v15 = vmov (%p197_p7), 0.0  }
  0x2e   : > { %v175_v1 = vshrl.u32 %v174_v0, 7  ;;  %v178_v2 = vand.u32 127, %v174_v0  ;;  %vm189_vm1 = vcmp.ge.f32.partialorder %v852_v9, 0.0  ;;  %vm193_vm2 = vcmp.ne.f32.partialorder %v852_v9, 255.0  ;;  %203 = vst [vmem:[#allocation2] sm:$0x1] (%p197_p7), %v761_v14 }
  0x2f   : > { %vm190_vm3 = vcmp.ge.f32.partialorder %v854_v10, 0.0  ;;  %vm194_vm5 = vcmp.ne.f32.partialorder %v854_v10, 255.0  ;;  %205 = vst [vmem:[#allocation4] sm:$0x1] (%p197_p7), %v761_v14  ;;  %204 = vst [vmem:[#allocation3] sm:$0x1] (%p197_p7), %v762_v15 }
  0x30   : > { %v176_v3 = vadd.s32 8, %v175_v1  ;;  %v183_v4 = vmul.u32 128, %v175_v1  ;;  %206 = vst [vmem:[#allocation5] sm:$0x1] (%p197_p7), %v762_v15  ;;  %207 = vst [vmem:[#allocation6] sm:$0x1] (%p197_p7), %v762_v15 }
  0x31   : > { %208 = vst [vmem:[#allocation7] sm:$0x1] (%p197_p7), %v762_v15 }
  0x32   : > { %v184_v5 = vmul.u32 128, %v176_v3  ;;  %v185_v6 = vadd.s32 %v183_v4, %v178_v2 }
  0x34   : > { %v186_v11 = vadd.s32 %v184_v5, %v178_v2  ;;  %vm187_vm0 = vcmp.lt.s32.totalorder %v185_v6, 2048  ;;  %202 = sbr.rel (!%p197_p7) target bundleno = 57 (0x39), region = 40 }
  0x35   : > { %vm191_vm4 = vmand %vm187_vm0, %vm189_vm1 }
  0x36   : > { %vm188_vm6 = vcmp.lt.s32.totalorder %v186_v11, 2048  ;;  %vm860_vm7 = vmand %vm191_vm4, %vm193_vm2 }
  0x37   : > { %vm192_vm8 = vmand %vm188_vm6, %vm190_vm3 }
  0x38   : > { %vm864_vm9 = vmand %vm192_vm8, %vm194_vm5 }
  0x39 PF: > { %p529_p3 = scmp.ne.s32.totalorder %s747_s9, 0 }
  0x3b   : > { %211 = sbr.rel (%p529_p3) target bundleno = 120 (0x78), region = 44 }
  0x40   : > { %v224_v16 = vsel %vm860_vm7, %v848_v7, -1e+30  ;;  %v763_v17 = vmov 0.0   ;;  %v225_v20 = vsel %vm864_vm9, %v850_v8, -1e+30 }
  0x41   : > { %v213_v18 = vsel %vm860_vm7, 1.0, %v763_v17  ;;  %v214_v19 = vsel %vm864_vm9, 1.0, %v763_v17  ;;  %v226_v22 = vmax.f32 %v224_v16, %v225_v20  ;;  %v262_v23 = vsel %vm860_vm7, %v852_v9, -1e+30  ;;  %v212_v40 = vld [vmem:[#allocation6] sm:$0x1] }
  0x42   : > { %v215_v21 = vadd.f32 %v214_v19, %v213_v18  ;;  %v263_v24 = vsel %vm864_vm9, %v854_v10, -1e+30  ;;  %v248_v41 = vld [vmem:[#allocation2] sm:$0x1]  ;;  %v286_v45 = vld [vmem:[#allocation4] sm:$0x1] }
  0x43   : > { %v264_v25 = vmax.f32 %v262_v23, %v263_v24  ;;  %v227_v27 = vrot.slane %v226_v22, 4 }
  0x44   : > { %v216_v26 = vrot.slane %v215_v21, 4 }
  0x45   : > { %v265_v28 = vrot.slane %v264_v25, 4  ;;  %v228_v30 = vmax.f32 %v226_v22, %v227_v27 }
  0x46   : > { %v217_v29 = vadd.f32 %v216_v26, %v215_v21 }
  0x47   : > { %v266_v31 = vmax.f32 %v264_v25, %v265_v28  ;;  %v229_v33 = vrot.slane %v228_v30, 2  ;;  %v250_v25 = vld [vmem:[#allocation3] sm:$0x1] }
  0x48   : > { %v218_v32 = vrot.slane %v217_v29, 2 }
  0x49   : > { %v267_v34 = vrot.slane %v266_v31, 2  ;;  %v230_v36 = vmax.f32 %v228_v30, %v229_v33  ;;  %v288_v33 = vld [vmem:[#allocation5] sm:$0x1] }
  0x4a   : > { %v219_v35 = vadd.f32 %v218_v32, %v217_v29 }
  0x4b   : > { %v268_v37 = vmax.f32 %v266_v31, %v267_v34  ;;  %v231_v39 = vrot.slane %v230_v36, 1 }
  0x4c   : > { %v220_v38 = vrot.slane %v219_v35, 1 }
  0x4d   : > { %v269_v42 = vrot.slane %v268_v37, 1  ;;  %v232_v44 = vmax.f32 %v230_v36, %v231_v39 }
  0x4e   : > { %v221_v43 = vadd.f32 %v220_v38, %v219_v35 }
  0x4f   : > { %v270_v46 = vmax.f32 %v268_v37, %v269_v42  ;;  %v233_v48 = vsub.f32 %v848_v7, %v232_v44  ;;  %v234_v49 = vsub.f32 %v850_v8, %v232_v44  ;;  %v249_v50 = vmax.f32 %v248_v41, %v232_v44 }
  0x50   : > { %v222_v47 = vadd.f32 %v221_v43, %v212_v40 }
  0x51   : > { %v271_v51 = vsub.f32 %v852_v9, %v270_v46  ;;  %v272_v52 = vsub.f32 %v854_v10, %v270_v46  ;;  %v287_v53 = vmax.f32 %v286_v45, %v270_v46  ;;  %v235_v54 = vmul.f32 1.442695, %v233_v48  ;;  %261 = vst [vmem:[#allocation2] sm:$0x1] %v249_v50 }
  0x52   : > { %223 = vst [vmem:[#allocation6] sm:$0x1] %v222_v47  ;;  %v237_v55 = vmul.f32 1.442695, %v234_v49  ;;  %v251_v58 = vsub.f32 %v248_v41, %v249_v50  ;;  %v255_v59 = vsub.f32 %v232_v44, %v249_v50 }
  0x53   : > { %299 = vst [vmem:[#allocation4] sm:$0x1] %v287_v53  ;;  %615 = vpow2.f32 %v235_v54  ;;  %v273_v56 = vmul.f32 1.442695, %v271_v51  ;;  %v275_v57 = vmul.f32 1.442695, %v272_v52  ;;  %v289_v61 = vsub.f32 %v286_v45, %v287_v53 }
  0x54   : > { %617 = vpow2.f32 %v237_v55  ;;  %v252_v60 = vmul.f32 1.442695, %v251_v58  ;;  %v256_v62 = vmul.f32 1.442695, %v255_v59  ;;  %v293_v63 = vsub.f32 %v270_v46, %v287_v53 }
  0x55   : > { %619 = vpow2.f32 %v273_v56  ;;  %v290_v0 = vmul.f32 1.442695, %v289_v61 }
  0x56   : > { %621 = vpow2.f32 %v275_v57  ;;  %v294_v4 = vmul.f32 1.442695, %v293_v63 }
  0x57   : > { %623 = vpow2.f32 %v252_v60 }
  0x58   : > { %625 = vpow2.f32 %v256_v62 }
  0x59   : > { %627 = vpow2.f32 %v290_v0 }
  0x5a   : > { %629 = vpow2.f32 %v294_v4 }
  0x60   : > { %v616_v1 = vpop.eup %615 }
  0x61   : > { %v618_v2 = vpop.eup %617  ;;  %v239_v3 = vsel %vm860_vm7, %v616_v1, 0.0 }
  0x62   : > { %v240_v5 = vsel %vm864_vm9, %v618_v2, 0.0  ;;  %v620_v11 = vpop.eup %619 }
  0x63   : > { %v241_v6 = vadd.f32 %v240_v5, %v239_v3  ;;  %v622_v14 = vpop.eup %621  ;;  %v277_v16 = vsel %vm860_vm7, %v620_v11, 0.0 }
  0x64   : > { %v278_v17 = vsel %vm864_vm9, %v622_v14, 0.0  ;;  %v624_v24 = vpop.eup %623 }
  0x65   : > { %v242_v15 = vrot.slane %v241_v6, 4  ;;  %v279_v19 = vadd.f32 %v278_v17, %v277_v16  ;;  %v626_v28 = vpop.eup %625  ;;  %v254_v30 = vmul.f32 %v624_v24, %v250_v25 }
  0x66   : > { %v628_v32 = vpop.eup %627 }
  0x67   : > { %v243_v18 = vadd.f32 %v242_v15, %v241_v6  ;;  %v280_v21 = vrot.slane %v279_v19, 4  ;;  %v630_v36 = vpop.eup %629  ;;  %v292_v39 = vmul.f32 %v628_v32, %v288_v33 }
  0x69   : > { %v244_v20 = vrot.slane %v243_v18, 2  ;;  %v281_v23 = vadd.f32 %v280_v21, %v279_v19 }
  0x6b   : > { %v245_v22 = vadd.f32 %v244_v20, %v243_v18  ;;  %v282_v27 = vrot.slane %v281_v23, 2 }
  0x6d   : > { %v246_v26 = vrot.slane %v245_v22, 1  ;;  %v283_v31 = vadd.f32 %v282_v27, %v281_v23 }
  0x6f   : > { %v247_v29 = vadd.f32 %v246_v26, %v245_v22  ;;  %v284_v35 = vrot.slane %v283_v31, 1 }
  0x71   : > { %v258_v34 = vmul.f32 %v626_v28, %v247_v29  ;;  %v285_v38 = vadd.f32 %v284_v35, %v283_v31 }
  0x73   : > { %v259_v37 = vadd.f32 %v258_v34, %v254_v30  ;;  %v296_v40 = vmul.f32 %v630_v36, %v285_v38 }
  0x75   : > { %260 = vst [vmem:[#allocation3] sm:$0x1] %v259_v37  ;;  %v297_v41 = vadd.f32 %v296_v40, %v292_v39 }
  0x77   : > { %298 = vst [vmem:[#allocation5] sm:$0x1] %v297_v41 }
  0x78 PF: > { %p300_p4 = scmp.eq.s32.totalorder %s747_s9, 1 }
  0x79   : > { %v305_v42 = vld [vmem:[#allocation2] sm:$0x1] (%p300_p4)  ;;  %vm306_vm10 = vcmask (%p300_p4), 1040384   ;;  %v340_v44 = vld [vmem:[#allocation4] sm:$0x1] (%p300_p4) }
  0x7a   : > { %304 = sbr.rel (!%p300_p4) target bundleno = 906 (0x38a), region = 48  ;;  %v307_v43 = vsel (%p300_p4), %vm306_vm10, %v305_v42, -inf  ;;  %v341_v45 = vsel (%p300_p4), %vm306_vm10, %v340_v44, -inf }
  0x7b   : > { %308 = vmax.xlane.f32.xlu0 (%p300_p4), %v307_v43  ;;  %342 = vmax.xlane.f32.xlu1 (%p300_p4), %v341_v45 }
  0x7c   : > { %v317_v56 = vld [vmem:[#allocation3] sm:$0x1] (%p300_p4) }
  0x7e   : > { %v351_v23 = vld [vmem:[#allocation5] sm:$0x1] (%p300_p4) }
 0x104   : > { %v309_v46 = vpop.xlane.xlu0 %308  ;;  %v343_v3 = vpop.xlane.xlu1 %342 }
 0x105   : > { %v310_v47 = vrot.slane %v309_v46, 4  ;;  %v344_v4 = vrot.slane %v343_v3, 4 }
 0x107   : > { %v311_v48 = vmax.f32 %v309_v46, %v310_v47  ;;  %v345_v5 = vmax.f32 %v343_v3, %v344_v4 }
 0x109   : > { %v312_v49 = vrot.slane %v311_v48, 2  ;;  %v346_v11 = vrot.slane %v345_v5, 2 }
 0x10b   : > { %v313_v50 = vmax.f32 %v311_v48, %v312_v49  ;;  %v347_v14 = vmax.f32 %v345_v5, %v346_v11 }
 0x10d   : > { %v314_v51 = vrot.slane %v313_v50, 1  ;;  %v348_v15 = vrot.slane %v347_v14, 1 }
 0x10f   : > { %v315_v52 = vmax.f32 %v313_v50, %v314_v51  ;;  %v349_v18 = vmax.f32 %v347_v14, %v348_v15 }
 0x111   : > { %540 = vpush %v315_v52 }
 0x142   : > { %s904_s29 = spop %540 }
 0x143   : > { %v318_v53 = vstv %s904_s29 }
 0x144   : > { %v319_v54 = vsub.f32 %v305_v42, %v318_v53 }
 0x146   : > { %v320_v55 = vmul.f32 1.442695, %v319_v54 }
 0x148   : > { %631 = vpow2.f32 %v320_v55 }
 0x155   : > { %v632_v57 = vpop.eup %631 }
 0x156   : > { %v322_v58 = vmul.f32 %v632_v57, %v317_v56 }
 0x158   : > { %v323_v59 = vsel %vm306_vm10, %v322_v58, 0.0 }
 0x159   : > { %324 = vadd.xlane.f32.xlu0 %v323_v59 }
 0x1e2   : > { %v325_v60 = vpop.xlane.xlu0 %324 }
 0x1e3   : > { %v326_v61 = vrot.slane %v325_v60, 4 }
 0x1e5   : > { %v327_v62 = vadd.f32 %v326_v61, %v325_v60 }
 0x1e7   : > { %v328_v63 = vrot.slane %v327_v62, 2 }
 0x1e9   : > { %v329_v0 = vadd.f32 %v328_v63, %v327_v62 }
 0x1eb   : > { %v330_v1 = vrot.slane %v329_v0, 1 }
 0x1ed   : > { %v331_v2 = vadd.f32 %v330_v1, %v329_v0 }
 0x1ef   : > { %542 = vpush %v331_v2 }
 0x220   : > { %s543_s30 = spop %542 }
 0x221   : > { %v333_v6 = vstv %s543_s30 }
 0x222   : > { %633 = vlog2.f32 %v333_v6 }
 0x22f   : > { %v634_v16 = vpop.eup %633 }
 0x230   : > { %v335_v17 = vmul.f32 0.6931472, %v634_v16 }
 0x232   : > { %544 = vpush %v335_v17 }
 0x233   : > { %546 = vpush %v349_v18 }
 0x263   : > { %s545_s3 = spop %544 }
 0x264   : > { %s337_s4 = sadd.f32 %s545_s3, %s904_s29  ;;  %s547_s5 = spop %546 }
 0x265   : > { %v352_v19 = vstv %s547_s5 }
 0x266   : > { %v338_v20 = vstv %s337_s4  ;;  %v353_v21 = vsub.f32 %v340_v44, %v352_v19 }
 0x267   : > { %339 = vst [vmem:[#allocation8] sm:$0x1] %v338_v20 }
 0x268   : > { %v354_v22 = vmul.f32 1.442695, %v353_v21 }
 0x26a   : > { %635 = vpow2.f32 %v354_v22 }
 0x277   : > { %v636_v24 = vpop.eup %635 }
 0x278   : > { %v356_v25 = vmul.f32 %v636_v24, %v351_v23 }
 0x27a   : > { %v357_v26 = vsel %vm306_vm10, %v356_v25, 0.0 }
 0x27b   : > { %358 = vadd.xlane.f32.xlu1 %v357_v26 }
 0x304   : > { %v359_v27 = vpop.xlane.xlu1 %358 }
 0x305   : > { %v360_v28 = vrot.slane %v359_v27, 4 }
 0x307   : > { %v361_v29 = vadd.f32 %v360_v28, %v359_v27 }
 0x309   : > { %v362_v30 = vrot.slane %v361_v29, 2 }
 0x30b   : > { %v363_v31 = vadd.f32 %v362_v30, %v361_v29 }
 0x30d   : > { %v364_v32 = vrot.slane %v363_v31, 1 }
 0x30f   : > { %v365_v33 = vadd.f32 %v364_v32, %v363_v31 }
 0x311   : > { %548 = vpush %v365_v33 }
 0x342   : > { %s549_s6 = spop %548 }
 0x343   : > { %v367_v34 = vstv %s549_s6 }
 0x344   : > { %637 = vlog2.f32 %v367_v34 }
 0x351   : > { %v638_v35 = vpop.eup %637 }
 0x352   : > { %v369_v36 = vmul.f32 0.6931472, %v638_v35 }
 0x354   : > { %550 = vpush %v369_v36 }
 0x385   : > { %s551_s7 = spop %550 }
 0x386   : > { %s371_s8 = sadd.f32 %s551_s7, %s547_s5 }
 0x388   : > { %v372_v37 = vstv %s371_s8 }
 0x389   : > { %373 = vst [vmem:[#allocation9] sm:$0x1] %v372_v37 }
 0x38a PF: > { %p531_p6 = scmp.ne.s32.totalorder %s747_s9, 1 }
 0x38c   : > { %376 = sbr.rel (%p531_p6) target bundleno = 956 (0x3bc), region = 52 }
 0x391   : > { %v533_v38 = vld [vmem:[#allocation9] ss:$0 sm:$0xff]  ;;  %v532_v41 = vld [vmem:[#allocation8] ss:$0 sm:$0xff]  ;;  %v409_v60 = vld [vmem:[#allocation7] sm:$0x1] }
 0x392   : > { %v393_v39 = vsub.f32 %v852_v9, %v533_v38  ;;  %v394_v40 = vsub.f32 %v854_v10, %v533_v38  ;;  %v384_v42 = vsub.f32 %v848_v7, %v532_v41  ;;  %v385_v43 = vsub.f32 %v850_v8, %v532_v41 }
 0x394   : > { %639 = vlog2.f32 %v393_v39  ;;  %vm395_vm11 = vcmp.eq.f32.partialorder %v393_v39, 0.0  ;;  %v405_v48 = vmul.f32 %v393_v39, %v384_v42  ;;  %vm396_vm12 = vcmp.eq.f32.partialorder %v394_v40, 0.0 }
 0x395   : > { %641 = vlog2.f32 %v394_v40  ;;  %v406_v50 = vmul.f32 %v394_v40, %v385_v43 }
 0x3a1   : > { %v640_v44 = vpop.eup %639 }
 0x3a2   : > { %v642_v45 = vpop.eup %641  ;;  %v398_v46 = vmul.f32 0.6931472, %v640_v44 }
 0x3a3   : > { %v400_v47 = vmul.f32 0.6931472, %v642_v45 }
 0x3a4   : > { %v401_v49 = vmul.f32 %v398_v46, %v393_v39 }
 0x3a5   : > { %v402_v51 = vmul.f32 %v400_v47, %v394_v40 }
 0x3a6   : > { %v403_v9 = vsel %vm395_vm11, 0.0, %v401_v49 }
 0x3a7   : > { %v404_v52 = vsel %vm396_vm12, 0.0, %v402_v51  ;;  %v407_v10 = vsub.f32 %v403_v9, %v405_v48 }
 0x3a8   : > { %v408_v53 = vsub.f32 %v404_v52, %v406_v50 }
 0x3a9   : > { %v410_v54 = vsel %vm860_vm7, %v407_v10, 0.0 }
 0x3aa   : > { %v411_v7 = vsel %vm864_vm9, %v408_v53, 0.0 }
 0x3ab   : > { %v412_v8 = vadd.f32 %v411_v7, %v410_v54 }
 0x3ad   : > { %v413_v55 = vrot.slane %v412_v8, 4 }
 0x3af   : > { %v414_v56 = vadd.f32 %v413_v55, %v412_v8 }
 0x3b1   : > { %v415_v57 = vrot.slane %v414_v56, 2 }
 0x3b3   : > { %v416_v58 = vadd.f32 %v415_v57, %v414_v56 }
 0x3b5   : > { %v417_v59 = vrot.slane %v416_v58, 1 }
 0x3b7   : > { %v418_v61 = vadd.f32 %v417_v59, %v416_v58 }
 0x3b9   : > { %v419_v62 = vadd.f32 %v418_v61, %v409_v60 }
 0x3bb   : > { %420 = vst [vmem:[#allocation7] sm:$0x1] %v419_v62 }
 0x3bc PF: > { %422 = sbr.rel (!%p300_p4) target bundleno = 1237 (0x4d5), region = 56  ;;  %vm424_vm13 = vcmask (%p300_p4), 1040384   ;;  %v435_v12 = vld [vmem:[#allocation6] sm:$0x1] (%p300_p4) }
 0x3bd   : > { %v436_v13 = vsel (%p300_p4), %vm424_vm13, %v435_v12, 0.0 }
 0x3c2   : > { %v423_v63 = vld [vmem:[#allocation7] sm:$0x1] }
 0x3c3   : > { %v425_v0 = vsel %vm424_vm13, %v423_v63, 0.0 }
 0x3c4   : > { %426 = vadd.xlane.f32.xlu0 %v425_v0 }
 0x3c8   : > { %437 = vadd.xlane.f32.xlu0 %v436_v13 }
 0x44d   : > { %v427_v1 = vpop.xlane.xlu0 %426 }
 0x44e   : > { %v428_v2 = vrot.slane %v427_v1, 4 }
 0x450   : > { %v429_v3 = vadd.f32 %v428_v2, %v427_v1 }
 0x451   : > { %v438_v4 = vpop.xlane.xlu0 %437 }
 0x452   : > { %v430_v5 = vrot.slane %v429_v3, 2  ;;  %v439_v6 = vrot.slane %v438_v4, 4 }
 0x454   : > { %v440_v11 = vadd.f32 %v439_v6, %v438_v4  ;;  %v431_v14 = vadd.f32 %v430_v5, %v429_v3 }
 0x456   : > { %v441_v15 = vrot.slane %v440_v11, 2  ;;  %v432_v16 = vrot.slane %v431_v14, 1 }
 0x458   : > { %v442_v17 = vadd.f32 %v441_v15, %v440_v11  ;;  %v433_v18 = vadd.f32 %v432_v16, %v431_v14 }
 0x45a   : > { %552 = vpush %v433_v18  ;;  %v443_v19 = vrot.slane %v442_v17, 1 }
 0x45c   : > { %v444_v20 = vadd.f32 %v443_v19, %v442_v17 }
 0x45e   : > { %554 = vpush %v444_v20 }
 0x48b   : > { %s553_s9 = spop %552 }
 0x48f   : > { %s555_s14 = spop %554 }
 0x490   : > { %v446_v21 = vstv %s555_s14 }
 0x491   : > { %643 = vrcp.f32 %v446_v21 }
 0x49e   : > { %v644_v22 = vpop.eup %643 }
 0x49f   : > { %556 = vpush %v644_v22 }
 0x4d0   : > { %s557_s15 = spop %556 }
 0x4d1   : > { %s449_s16 = smul.f32 %s557_s15, %s553_s9 }
 0x4d3   : > { %v450_v23 = vstv %s449_s16 }
 0x4d4   : > { %451 = vst [vmem:[#allocation15] sm:$0x1] %v450_v23 }
 0x4d5 PF: > { %p923_p12 = scmp.eq.s32.totalorder %s521_s12, 1  ;;  %s764_s18 = smov [#allocation15]  }
 0x4d6   : > { %s459_s19 = sshll.u32 %s764_s18, 4  ;;  %s460_s19 = int_to_ptr.vmem [resolvable:$true] %s459_s19 }
 0x4d7   : > { %s697_s20 = scalar_lea.vmem %s460_s19, 16  ;;  %s703_s21 = scalar_lea.vmem %s460_s19, 32 }
 0x4d8   : > { %p698_p13 = scmp.ne.s32.totalorder %s460_s19, %s697_s20  ;;  %p704_p2 = scmp.lt.s32.totalorder %s460_s19, %s460_s19 }
 0x4d9   : > { %p705_p5 = scmp.lt.s32.totalorder %s703_s21, %s697_s20 }
 0x4da   : > { %p699_p0 = pnand %p698_p13, %p923_p12 }
 0x4db   : > { %p706_p8 = por %p705_p5, %p704_p2 }
 0x4dc   : > { %p700_p1 = pneg %p699_p0 }
 0x4de   : > { %p707_p9 = pnand %p706_p8, %p700_p1 }
 0x4e0   : > { %710 = shalt.err (!%p707_p9)
}
 0x4e1   : > { %567 = dma.vmem_to_hbm [thread:$0]  (%p923_p12), %s460_s19, 16, %s949_s2, [#allocation12]  }
 0x4e2   : > { %742 = dma.done.wait (%p923_p12), [#allocation12], 16  }
 0x4e3   : > { %744 = vsyncadd (%p923_p12), [#allocation12], 4294967280 }
 0x4e4 PF: > { %s15_s11 = sadd.s32 1, %s755_s11   ;;  %s958_s9 = smov %s751_s10 }
 0x4e5   : > { %p12_p11 = scmp.ge.s32.totalorder %s15_s11, 4   ;;  %s959_s10 = smov %s961_s13 }
 0x4e7   :  { %14 = sbr.rel (!%p12_p11) target bundleno = 4 (0x4), region = 83 }
 0x4ec   :  { %472 = vsyncpa [#allocation11], 1 }
 0x4ed   :  { %474 = vsyncpa [#allocation11 + $0x1], 1 }
 0x4ee   :  { %475 = vsyncpa [#allocation14], 1 }
 0x4ef   :  { %476 = vsyncpa [#allocation12], 1 }
 0x4f0   :  { %478 = vsyncpa [#allocation12 + $0x1], 1 }

</bundles_post_ra>
